<compile_context>
chip_gen: v7x
topology: tpu7x:2x2x1
jax: 0.10.0
libtpu: 0.0.40
codegen_flags: <defaults>
</compile_context>

<pallas_src>
import math

import jax
import jax.numpy as jnp
from jax.experimental import pallas as pl
from jax.experimental.pallas import tpu as pltpu


_LANE = 128               # vreg lane width
_SUBLANE = 8              # f32 sublanes per vreg -> row-block height TR
_ACC_W = 1024             # lane width of chunk slices / resident accumulators
_TS_MAX = 128 * 1024      # 131072 lanes -> 4 MiB f32 per input block (v7x-safe)
_NUM_SPLITS = 2           # spatial 'parallel' splits (feeds both TCs on v7x)
_SPLIT_MIN = 32 * 1024    # min columns per split before splitting is worth it


def _spatial_plan(S):
    """Pick (TS, n_s, num_splits, W) with n_s*TS <= S, TS % W == 0.

    TS is the per-grid-step tile width (multiple of W), n_s the number of
    spatial tiles, W the lane width of the resident per-row accumulator.
    TS == 0 means "too small for the kernel, do it in plain JAX".
    """
    if S < _LANE:
        return 0, 0, 1, 0
    if S < _ACC_W:
        TS = (S // _LANE) * _LANE
        return TS, 1, 1, TS
    num_splits = _NUM_SPLITS if S >= _NUM_SPLITS * _SPLIT_MIN else 1
    n_s = -(-S // _TS_MAX)                        # ceil: number of tiles
    n_s = -(-n_s // num_splits) * num_splits      # multiple of num_splits
    TS = (S // n_s) // _ACC_W * _ACC_W            # >= _ACC_W by construction
    assert TS >= _ACC_W and TS <= _TS_MAX and TS % _ACC_W == 0
    return TS, n_s, num_splits, _ACC_W


def _dice_sums_kernel(pred_ref, gt_ref, inter_ref, union_ref):
    """Accumulate per-row partial sums for one (TR, TS) tile.

    pred_ref, gt_ref : (TR, TS) input tiles (any float dtype; cast to f32)
    inter_ref        : (TR, W)  resident f32 accumulator of sum(pred * gt)
    union_ref        : (TR, W)  resident f32 accumulator of sum(pred^2 + gt)
    Output blocks are resident across the spatial (last, "arbitrary") grid
    axis: their index_map is constant in s.
    """
    s = pl.program_id(2)

    @pl.when(s == 0)
    def _():
        inter_ref[...] = jnp.zeros_like(inter_ref)
        union_ref[...] = jnp.zeros_like(union_ref)

    tr, ts = pred_ref.shape
    w = inter_ref.shape[-1]
    assert ts % w == 0, (ts, w)   # fail loudly if the chunk invariant breaks

    # Pure-VPU hot loop over static, 128-aligned lane-tile slices (aligned
    # unmasked vector loads, no XLU cross-lane reduce, no dynamic lane-dim
    # slicing).  Accumulating directly into the resident output refs keeps
    # live ranges ~one chunk wide, so vreg pressure stays flat as TS grows.
    for j in range(ts // w):
        pj = pred_ref[:, j * w:(j + 1) * w].astype(jnp.float32)
        gj = gt_ref[:, j * w:(j + 1) * w].astype(jnp.float32)
        inter_ref[...] += pj * gj
        union_ref[...] += pj * pj + gj


def _dice_partial_sums(pred_rs, gt_rs, *, TR, R_main, TS, n_s, num_splits, W):
    """Kernel over the aligned main rectangle rows[:R_main] x cols[:n_s*TS].

    Returns two (num_splits, R_main, W) f32 arrays whose sum over axes (0, 2)
    is the per-row sum of pred*gt / pred^2+gt over the main columns.
    """
    n_sp = n_s // num_splits
    grid = (R_main // TR, num_splits, n_sp)

    in_map = lambda r, p, s: (r, p * n_sp + s)
    out_map = lambda r, p, s: (p, r, 0)

    grid_spec = pltpu.PrefetchScalarGridSpec(
        num_scalar_prefetch=0,
        grid=grid,
        in_specs=[
            pl.BlockSpec((TR, TS), in_map),
            pl.BlockSpec((TR, TS), in_map),
        ],
        out_specs=[
            pl.BlockSpec((None, TR, W), out_map),
            pl.BlockSpec((None, TR, W), out_map),
        ],
    )

    inter, union = pl.pallas_call(
        _dice_sums_kernel,
        grid_spec=grid_spec,
        out_shape=(
            jax.ShapeDtypeStruct((num_splits, R_main, W), jnp.float32),
            jax.ShapeDtypeStruct((num_splits, R_main, W), jnp.float32),
        ),
        compiler_params=pltpu.CompilerParams(
            # (row blocks, spatial split) write disjoint output blocks ->
            # safe to shard across TCs (dual-TC on v7x); the last axis is the
            # sequential spatial reduction.
            dimension_semantics=("parallel", "parallel", "arbitrary"),
            # ~16-17 MiB double-buffered pipeline at TS=131072 f32; explicit
            # limit needed on v5e (16 MiB scoped default), safe on v7x (64 MiB
            # physical).  v5e/v6e could sweep larger tiles under 64 MiB.
            vmem_limit_bytes=32 * 1024 * 1024,
        ),
    )(pred_rs, gt_rs)
    return inter, union


def dice_loss(target_nchw, predict_nchw):
    """Mirrors DiceLoss.forward for target[target_key], predict[output_key]."""
    assert target_nchw.shape == predict_nchw.shape
    shape = target_nchw.shape
    N, C = shape[0], shape[1]
    S = int(math.prod(shape[2:]))
    R = N * C

    # Contiguous (hence free) reshape to a sublane-dense (rows, spatial) slab.
    pred_rs = predict_nchw.reshape(R, S)
    gt_rs = target_nchw.reshape(R, S)

    TR = _SUBLANE
    R_main = (R // TR) * TR
    TS, n_s, num_splits, W = _spatial_plan(S)
    S_main = TS * n_s

    if R_main > 0 and TS > 0:
        inter_p, union_p = _dice_partial_sums(
            pred_rs, gt_rs, TR=TR, R_main=R_main, TS=TS, n_s=n_s,
            num_splits=num_splits, W=W)
        inter_rows_main = inter_p.sum(axis=(0, 2))        # (R_main,)
        union_rows_main = union_p.sum(axis=(0, 2))        # (R_main,)

        # Ragged column tail (cols S_main:S) for the kernel rows — tiny fused
        # plain-JAX reduction; zero-width slice is a no-op.  No padded copies.
        p_t = pred_rs[:R_main, S_main:].astype(jnp.float32)
        g_t = gt_rs[:R_main, S_main:].astype(jnp.float32)
        inter_rows_main = inter_rows_main + (p_t * g_t).sum(axis=1)
        union_rows_main = union_rows_main + (p_t * p_t + g_t).sum(axis=1)

        # Ragged row tail (rows R_main:R) over the full spatial extent.
        p_b = pred_rs[R_main:].astype(jnp.float32)
        g_b = gt_rs[R_main:].astype(jnp.float32)
        inter_rows = jnp.concatenate(
            [inter_rows_main, (p_b * g_b).sum(axis=1)])
        union_rows = jnp.concatenate(
            [union_rows_main, (p_b * p_b + g_b).sum(axis=1)])
    else:
        # Too small for the kernel (R < 8 or S < 128): plain JAX.
        p = pred_rs.astype(jnp.float32)
        g = gt_rs.astype(jnp.float32)
        inter_rows = (p * g).sum(axis=1)
        union_rows = (p * p + g).sum(axis=1)

    # Tiny final reductions + epsilons + divide + mean in plain JAX.
    intersection = inter_rows.reshape(N, C).sum(axis=0) + 1e-06   # (C,)
    union_s = union_rows.reshape(N, C).sum(axis=0) + 2e-06        # (C,)
    dice = 2.0 * intersection / union_s
    return 1.0 - jnp.mean(dice)


def dice_loss_reference(target_nchw, predict_nchw):
    """Pure-JAX reference matching the PyTorch module exactly."""
    shape = target_nchw.shape
    pred = predict_nchw.reshape(shape[0], shape[1], -1)
    gt = target_nchw.reshape(shape[0], shape[1], -1)
    intersection = (pred * gt).sum(axis=(0, 2)) + 1e-06
    union = (pred ** 2 + gt).sum(axis=(0, 2)) + 2e-06
    dice = 2.0 * intersection / union
    return 1.0 - jnp.mean(dice)


def _make_inputs(key, shape):
    k1, k2 = jax.random.split(key)
    predict = jax.nn.sigmoid(jax.random.normal(k1, shape, jnp.float32))
    target = (jax.random.uniform(k2, shape, jnp.float32) > 0.5).astype(
        jnp.float32)
    return target, predict


if __name__ == "__main__":
    # DiceLoss.__init__ only stores dict keys; there are no learnable params.
    key = jax.random.PRNGKey(0)
    k_a, k_b = jax.random.split(key)

    # Primary small NCHW shape consistent with the module.
    target_a, predict_a = _make_inputs(k_a, (2, 4, 16, 16))
    # The module takes dicts; emulate that glue here.
    target_dict = {"mask": target_a}
    predict_dict = {"logits": predict_a}

    loss_a = jax.block_until_ready(
        dice_loss(target_dict["mask"], predict_dict["logits"]))
    ref_a = jax.block_until_ready(
        dice_loss_reference(target_dict["mask"], predict_dict["logits"]))
    assert jnp.allclose(loss_a, ref_a, rtol=1e-5, atol=1e-6), (loss_a, ref_a)

    # Small ragged shape: exercises the no-pad row/column tail handling.
    target_b, predict_b = _make_inputs(k_b, (3, 3, 20, 21))
    loss_b = jax.block_until_ready(dice_loss(target_b, predict_b))
    ref_b = jax.block_until_ready(dice_loss_reference(target_b, predict_b))
    assert jnp.allclose(loss_b, ref_b, rtol=1e-5, atol=1e-6), (loss_b, ref_b)

    print("KERNEL_OK")
</pallas_src>

<mosaic_0001>
module attributes {stable_mosaic.version = 11 : i64} {
  func.func @_dice_sums_kernel(%arg0: i32, %arg1: i32, %arg2: i32, %arg3: memref<8x256xf32, #tpu.memory_space<vmem>>, %arg4: memref<8x256xf32, #tpu.memory_space<vmem>>, %arg5: memref<1x8x256xf32, #tpu.memory_space<vmem>>, %arg6: memref<1x8x256xf32, #tpu.memory_space<vmem>>) attributes {dimension_semantics = [#tpu.dimension_semantics<parallel>, #tpu.dimension_semantics<parallel>, #tpu.dimension_semantics<arbitrary>], iteration_bounds = array<i64: 1, 1, 1>, scalar_prefetch = 0 : i64, scratch_operands = 0 : i64, tpu.core_type = #tpu.core_type<tc>, window_params = [{transform_indices = @transform_0, window_bounds = array<i64: 8, 256>}, {transform_indices = @transform_1, window_bounds = array<i64: 8, 256>}, {transform_indices = @transform_2, window_bounds = array<i64: 1, 8, 256>}, {transform_indices = @transform_3, window_bounds = array<i64: 1, 8, 256>}]} {
    %c0_i32 = arith.constant 0 : i32
    %0 = arith.cmpi eq, %arg2, %c0_i32 : i32
    %1 = arith.extui %0 : i1 to i32
    %c0_i32_0 = arith.constant 0 : i32
    %2 = arith.cmpi ne, %1, %c0_i32_0 : i32
    scf.if %2 {
      %cst = arith.constant 0.000000e+00 : f32
      %20 = vector.broadcast %cst : f32 to vector<8x256xf32>
      %c0_16 = arith.constant 0 : index
      %c0_17 = arith.constant 0 : index
      %c0_18 = arith.constant 0 : index
      %21 = vector.load %arg5[%c0_16, %c0_17, %c0_18] : memref<1x8x256xf32, #tpu.memory_space<vmem>>, vector<1x8x256xf32>
      %22 = vector.shape_cast %21 : vector<1x8x256xf32> to vector<8x256xf32>
      %23 = vector.shape_cast %20 : vector<8x256xf32> to vector<1x8x256xf32>
      tpu.vector_store %arg5[%c0_16, %c0_17, %c0_18], %23 {strides = array<i32>} : memref<1x8x256xf32, #tpu.memory_space<vmem>>, vector<1x8x256xf32>,
      %cst_19 = arith.constant 0.000000e+00 : f32
      %24 = vector.broadcast %cst_19 : f32 to vector<8x256xf32>
      %c0_20 = arith.constant 0 : index
      %c0_21 = arith.constant 0 : index
      %c0_22 = arith.constant 0 : index
      %25 = vector.load %arg6[%c0_20, %c0_21, %c0_22] : memref<1x8x256xf32, #tpu.memory_space<vmem>>, vector<1x8x256xf32>
      %26 = vector.shape_cast %25 : vector<1x8x256xf32> to vector<8x256xf32>
      %27 = vector.shape_cast %24 : vector<8x256xf32> to vector<1x8x256xf32>
      tpu.vector_store %arg6[%c0_20, %c0_21, %c0_22], %27 {strides = array<i32>} : memref<1x8x256xf32, #tpu.memory_space<vmem>>, vector<1x8x256xf32>,
    } else {
    }
    %c0 = arith.constant 0 : index
    %c0_1 = arith.constant 0 : index
    %3 = vector.load %arg3[%c0, %c0_1] : memref<8x256xf32, #tpu.memory_space<vmem>>, vector<8x256xf32>
    %c0_2 = arith.constant 0 : index
    %c0_3 = arith.constant 0 : index
    %4 = vector.load %arg4[%c0_2, %c0_3] : memref<8x256xf32, #tpu.memory_space<vmem>>, vector<8x256xf32>
    %c0_4 = arith.constant 0 : index
    %c0_5 = arith.constant 0 : index
    %c0_6 = arith.constant 0 : index
    %5 = vector.load %arg5[%c0_4, %c0_5, %c0_6] : memref<1x8x256xf32, #tpu.memory_space<vmem>>, vector<1x8x256xf32>
    %6 = vector.shape_cast %5 : vector<1x8x256xf32> to vector<8x256xf32>
    %7 = arith.mulf %3, %4 : vector<8x256xf32>
    %8 = arith.addf %6, %7 : vector<8x256xf32>
    %c0_7 = arith.constant 0 : index
    %c0_8 = arith.constant 0 : index
    %c0_9 = arith.constant 0 : index
    %9 = vector.load %arg5[%c0_7, %c0_8, %c0_9] : memref<1x8x256xf32, #tpu.memory_space<vmem>>, vector<1x8x256xf32>
    %10 = vector.shape_cast %9 : vector<1x8x256xf32> to vector<8x256xf32>
    %11 = vector.shape_cast %8 : vector<8x256xf32> to vector<1x8x256xf32>
    tpu.vector_store %arg5[%c0_7, %c0_8, %c0_9], %11 {strides = array<i32>} : memref<1x8x256xf32, #tpu.memory_space<vmem>>, vector<1x8x256xf32>,
    %c0_10 = arith.constant 0 : index
    %c0_11 = arith.constant 0 : index
    %c0_12 = arith.constant 0 : index
    %12 = vector.load %arg6[%c0_10, %c0_11, %c0_12] : memref<1x8x256xf32, #tpu.memory_space<vmem>>, vector<1x8x256xf32>
    %13 = vector.shape_cast %12 : vector<1x8x256xf32> to vector<8x256xf32>
    %14 = arith.mulf %3, %3 : vector<8x256xf32>
    %15 = arith.addf %14, %4 : vector<8x256xf32>
    %16 = arith.addf %13, %15 : vector<8x256xf32>
    %c0_13 = arith.constant 0 : index
    %c0_14 = arith.constant 0 : index
    %c0_15 = arith.constant 0 : index
    %17 = vector.load %arg6[%c0_13, %c0_14, %c0_15] : memref<1x8x256xf32, #tpu.memory_space<vmem>>, vector<1x8x256xf32>
    %18 = vector.shape_cast %17 : vector<1x8x256xf32> to vector<8x256xf32>
    %19 = vector.shape_cast %16 : vector<8x256xf32> to vector<1x8x256xf32>
    tpu.vector_store %arg6[%c0_13, %c0_14, %c0_15], %19 {strides = array<i32>} : memref<1x8x256xf32, #tpu.memory_space<vmem>>, vector<1x8x256xf32>,
    return
  }
  func.func @transform_0(%arg0: i32, %arg1: i32, %arg2: i32) -> (i32, i32) {
    %c1_i32 = arith.constant 1 : i32
    %0 = arith.muli %arg1, %c1_i32 : i32
    %1 = arith.addi %0, %arg2 : i32
    %c0_i32 = arith.constant 0 : i32
    return %arg0, %1 : i32, i32
  }
  func.func @transform_1(%arg0: i32, %arg1: i32, %arg2: i32) -> (i32, i32) {
    %c1_i32 = arith.constant 1 : i32
    %0 = arith.muli %arg1, %c1_i32 : i32
    %1 = arith.addi %0, %arg2 : i32
    %c0_i32 = arith.constant 0 : i32
    return %arg0, %1 : i32, i32
  }
  func.func @transform_2(%arg0: i32, %arg1: i32, %arg2: i32) -> (i32, i32, i32) {
    %c0_i32 = arith.constant 0 : i32
    %c0_i32_0 = arith.constant 0 : i32
    return %arg1, %arg0, %c0_i32 : i32, i32, i32
  }
  func.func @transform_3(%arg0: i32, %arg1: i32, %arg2: i32) -> (i32, i32, i32) {
    %c0_i32 = arith.constant 0 : i32
    %c0_i32_0 = arith.constant 0 : i32
    return %arg1, %arg0, %c0_i32 : i32, i32, i32
  }
}

</mosaic_0001>

<bundles_post_ra>
// kernel: tpu_custom_call.1
= control target key start
LH: loop header
LB: loop body
LE: loop exit
PB: predicated region body
PF: predicated region fallthrough
CT: control target
= control target key end

     0   :  { %9 = vsyncpa [#allocation3], 0  ;;  %s291_s0 = inlined_call_operand.hbm [shape: f32[8,256], index: 0, kind: input, shape index: {}]   ;;  %s292_s1 = inlined_call_operand.hbm [shape: f32[8,256], index: 1, kind: input, shape index: {}]   ;;  %s293_s2 = inlined_call_operand.hbm [shape: f32[1,8,256], index: 2, kind: output, shape index: {0}]   ;;  %s294_s3 = inlined_call_operand.hbm [shape: f32[1,8,256], index: 3, kind: output, shape index: {1}]  }
   0x1   :  { %10 = vsyncpa [#allocation6], 0 }
   0x2   :  { %11 = vsyncpa [#allocation4], 0 }
   0x3   :  { %12 = vsyncpa [#allocation9], 0  ;;  %s212_s12 = smov [#allocation2]   ;;  %s213_s14 = smov [#allocation5]  }
   0x4   :  { %s23_s13 = sshll.u32 %s212_s12, 4  ;;  %s37_s15 = sshll.u32 %s213_s14, 4  ;;  %s24_s13 = int_to_ptr.vmem [resolvable:$true] %s23_s13  ;;  %s38_s15 = int_to_ptr.vmem [resolvable:$true] %s37_s15 }
   0x5   :  { %s116_s18 = scalar_lea.hbm %s291_s0, 256 }
   0x6   :  { %p117_p0 = scmp.ne.s32.totalorder %s291_s0, %s116_s18  ;;  %p120_p1 = scmp.lt.u32.totalorder %s116_s18, %s291_s0 }
   0x8   :  { %p122_p2 = pnand %p120_p1, %p117_p0 }
   0xa   :  { %125 = shalt.err (!%p122_p2)
}
   0xb   :  { %s126_s23 = scalar_lea.vmem %s24_s13, 256  ;;  %p131_p4 = scmp.lt.s32.totalorder %s24_s13, %s24_s13 }
   0xc   :  { %p127_p3 = scmp.ne.s32.totalorder %s24_s13, %s126_s23  ;;  %p132_p5 = scmp.lt.s32.totalorder %s126_s23, %s126_s23 }
   0xe   :  { %p133_p6 = por %p132_p5, %p131_p4 }
  0x10   :  { %p134_p7 = pnand %p133_p6, %p127_p3 }
  0x12   :  { %137 = shalt.err (!%p134_p7)
}
  0x13   :  { %26 = dma.hbm_to_vmem [thread:$0]  %s291_s0, 256, %s24_s13, [#allocation3]  }
  0x14   :  { %s138_s28 = scalar_lea.hbm %s292_s1, 256 }
  0x15   :  { %p139_p8 = scmp.ne.s32.totalorder %s292_s1, %s138_s28  ;;  %p142_p9 = scmp.lt.u32.totalorder %s138_s28, %s292_s1 }
  0x17   :  { %p144_p10 = pnand %p142_p9, %p139_p8 }
  0x19   :  { %147 = shalt.err (!%p144_p10)
}
  0x1a   :  { %s148_s6 = scalar_lea.vmem %s38_s15, 256  ;;  %p153_p12 = scmp.lt.s32.totalorder %s38_s15, %s38_s15 }
  0x1b   :  { %p149_p11 = scmp.ne.s32.totalorder %s38_s15, %s148_s6  ;;  %p154_p13 = scmp.lt.s32.totalorder %s148_s6, %s148_s6 }
  0x1d   :  { %p155_p0 = por %p154_p13, %p153_p12 }
  0x1f   :  { %p156_p1 = pnand %p155_p0, %p149_p11 }
  0x21   :  { %159 = shalt.err (!%p156_p1)
}
  0x22   :  { %40 = dma.hbm_to_vmem [thread:$0]  %s292_s1, 256, %s38_s15, [#allocation6]  }
  0x23   :  { %204 = dma.done.wait [#allocation3], 256  }
  0x24   :  { %205 = vsyncadd [#allocation3], 4294967040 }
  0x25   :  { %206 = dma.done.wait [#allocation6], 256  }
  0x26   :  { %207 = vsyncadd [#allocation6], 4294967040  ;;  %v59_v0 = vld [vmem:[#allocation2] sm:$0xff]  ;;  %v61_v1 = vld [vmem:[#allocation5] sm:$0xff]  ;;  %s214_s8 = smov [#allocation7]   ;;  %s215_s10 = smov [#allocation8]  }
  0x27   :  { %v60_v2 = vld [vmem:[#allocation2 + $0x8] sm:$0xff]  ;;  %v65_v3 = vmul.f32 %v61_v1, %v59_v0  ;;  %v62_v4 = vld [vmem:[#allocation5 + $0x8] sm:$0xff]  ;;  %v73_v5 = vmul.f32 %v59_v0, %v59_v0  ;;  %s87_s9 = sshll.u32 %s214_s8, 4  ;;  %s97_s11 = sshll.u32 %s215_s10, 4  ;;  %s88_s9 = int_to_ptr.vmem [resolvable:$true] %s87_s9  ;;  %s260_s11 = int_to_ptr.vmem [resolvable:$true] %s97_s11 }
  0x28   :  { %v74_v6 = vmul.f32 %v60_v2, %v60_v2  ;;  %v66_v7 = vmul.f32 %v62_v4, %v60_v2  ;;  %s160_s1 = scalar_lea.vmem %s88_s9, 256  ;;  %p165_p3 = scmp.lt.s32.totalorder %s88_s9, %s88_s9 }
  0x29   :  { %v75_v8 = vadd.f32 %v73_v5, %v61_v1  ;;  %69 = vst [vmem:[#allocation7] sm:$0xff] %v65_v3  ;;  %p161_p2 = scmp.ne.s32.totalorder %s88_s9, %s160_s1  ;;  %p166_p4 = scmp.lt.s32.totalorder %s160_s1, %s160_s1 }
  0x2a   :  { %v76_v9 = vadd.f32 %v74_v6, %v62_v4  ;;  %70 = vst [vmem:[#allocation7 + $0x8] sm:$0xff] %v66_v7 }
  0x2b   :  { %79 = vst [vmem:[#allocation8] sm:$0xff] %v75_v8  ;;  %p167_p5 = por %p166_p4, %p165_p3 }
  0x2c   :  { %80 = vst [vmem:[#allocation8 + $0x8] sm:$0xff] %v76_v9 }
  0x2d   :  { %p168_p6 = pnand %p167_p5, %p161_p2 }
  0x2f   :  { %171 = shalt.err (!%p168_p6)
}
  0x30   :  { %s172_s14 = scalar_lea.hbm %s293_s2, 256 }
  0x31   :  { %p173_p7 = scmp.ne.s32.totalorder %s293_s2, %s172_s14  ;;  %p176_p8 = scmp.lt.u32.totalorder %s172_s14, %s293_s2 }
  0x33   :  { %p178_p9 = pnand %p176_p8, %p173_p7 }
  0x35   :  { %181 = shalt.err (!%p178_p9)
}
  0x36   :  { %90 = dma.vmem_to_hbm [thread:$0]  %s88_s9, 256, %s293_s2, [#allocation4]  }
  0x37   :  { %s182_s21 = scalar_lea.vmem %s260_s11, 256  ;;  %p187_p11 = scmp.lt.s32.totalorder %s260_s11, %s260_s11 }
  0x38   :  { %p183_p10 = scmp.ne.s32.totalorder %s260_s11, %s182_s21  ;;  %p188_p12 = scmp.lt.s32.totalorder %s182_s21, %s182_s21 }
  0x3a   :  { %p189_p13 = por %p188_p12, %p187_p11 }
  0x3c   :  { %p190_p0 = pnand %p189_p13, %p183_p10 }
  0x3e   :  { %193 = shalt.err (!%p190_p0)
}
  0x3f   :  { %s194_s24 = scalar_lea.hbm %s294_s3, 256 }
  0x40   :  { %p195_p1 = scmp.ne.s32.totalorder %s294_s3, %s194_s24  ;;  %p198_p2 = scmp.lt.u32.totalorder %s194_s24, %s294_s3 }
  0x42   :  { %p200_p3 = pnand %p198_p2, %p195_p1 }
  0x44   :  { %203 = shalt.err (!%p200_p3)
}
  0x45   :  { %100 = dma.vmem_to_hbm [thread:$0]  %s260_s11, 256, %s294_s3, [#allocation9]  }
  0x46   :  { %208 = dma.done.wait [#allocation4], 256  }
  0x47   :  { %209 = vsyncadd [#allocation4], 4294967040 }
  0x48   :  { %210 = dma.done.wait [#allocation9], 256  }
  0x49   :  { %211 = vsyncadd [#allocation9], 4294967040 }
  0x4a   :  { %107 = vsyncpa [#allocation3], 1 }
  0x4b   :  { %108 = vsyncpa [#allocation6], 1 }
  0x4c   :  { %109 = vsyncpa [#allocation4], 1 }
  0x4d   :  { %110 = vsyncpa [#allocation9], 1 }

</bundles_post_ra>
